<compile_context>
chip_gen: v5e
topology: v5e:2x2
jax: 0.10.0
libtpu: 0.0.40
codegen_flags: <defaults>
</compile_context>

<pallas_src>
import functools

import jax
import jax.numpy as jnp
from jax.experimental import pallas as pl
from jax.experimental.pallas import tpu as pltpu


# ---------------------------------------------------------------------------
# Kernel
# ---------------------------------------------------------------------------
def _coupling_kernel(inplace, p_ref, x_ref, z_ref, ls_ref):
    """One batch tile of the coupling layer, in transposed (feature, batch) layout.

    p_ref  : SMEM (4,)  = [scale, scale_shift, g_scale, g_shift]
    x_ref  : VMEM (2, tn)   rows = (x1, x2), lanes = batch
    z_ref  : VMEM (2, tn)   rows = (z1, z2)
    ls_ref : VMEM (1, tn)   log_scale
    """
    scale = p_ref[0]
    scale_shift = p_ref[1]
    g_scale = p_ref[2]
    g_shift = p_ref[3]

    x = x_ref[...]                      # (2, tn), lane-dense
    x1 = x[0:1, :]                      # (1, tn)
    x2 = x[1:2, :]                      # (1, tn)

    # Which half conditions, which half gets transformed (static Python branch).
    cond = x1 if inplace == 0 else x2
    other = x2 if inplace == 0 else x1

    # All of this is full-lane-width VPU/EUP work.
    log_scale = scale * jnp.tanh(g_scale * cond) + scale_shift   # (1, tn)
    z_other = jnp.exp(log_scale) * other + g_shift               # (1, tn)

    if inplace == 0:
        z = jnp.concatenate([cond, z_other], axis=0)             # (z1, z2)
    else:
        z = jnp.concatenate([z_other, cond], axis=0)             # (z1, z2)

    z_ref[...] = z                      # unmasked lane-dense store
    ls_ref[...] = log_scale             # unmasked lane-dense store


# ---------------------------------------------------------------------------
# Wrapper
# ---------------------------------------------------------------------------
def simple_coupling_layer_2d(x, params, inplace=0, tn=512):
    """x: (N, 2). Returns (z (N, 2), log_scale (N, 1)) like the PyTorch forward."""
    N = x.shape[0]
    assert x.shape[1] == 2, "expected 2-D points of shape (N, 2)"
    x = x.astype(jnp.float32)

    # Tile must be a multiple of the 128-lane width; don't make it bigger than
    # the (lane-rounded) batch.
    n_round = ((N + 127) // 128) * 128
    tn = max(128, min((tn // 128) * 128, n_round))
    n_pad = pl.cdiv(N, tn) * tn

    # Transposed, lane-dense layout: (2, N_pad). Cheap XLA transpose/pad.
    xt = jnp.pad(x.T, ((0, 0), (0, n_pad - N)))

    # Pack the four scalar parameters into a single SMEM array.
    packed = jnp.concatenate([
        jnp.reshape(params["scale"], (1,)),
        jnp.reshape(params["scale_shift"], (1,)),
        jnp.reshape(params["g_scale"], (1,)),
        jnp.reshape(params["g_shift"], (1,)),
    ]).astype(jnp.float32)

    grid = (n_pad // tn,)
    kernel = functools.partial(_coupling_kernel, inplace)

    z_t, ls_t = pl.pallas_call(
        kernel,
        grid=grid,
        in_specs=[
            pl.BlockSpec(memory_space=pltpu.MemorySpace.SMEM),    # packed scalars
            pl.BlockSpec((2, tn), lambda i: (0, i)),              # x (transposed)
        ],
        out_specs=(
            pl.BlockSpec((2, tn), lambda i: (0, i)),              # z (transposed)
            pl.BlockSpec((1, tn), lambda i: (0, i)),              # log_scale
        ),
        out_shape=(
            jax.ShapeDtypeStruct((2, n_pad), jnp.float32),
            jax.ShapeDtypeStruct((1, n_pad), jnp.float32),
        ),
        compiler_params=pltpu.CompilerParams(
            dimension_semantics=("parallel",)),
    )(packed, xt)

    z = z_t[:, :N].T            # (N, 2)
    log_scale = ls_t[:, :N].T   # (N, 1)
    return z, log_scale


# ---------------------------------------------------------------------------
# Deterministic parameter init (matches the module: N(0, 0.02) scalars)
# ---------------------------------------------------------------------------
def init_params(key):
    ks = jax.random.split(key, 4)
    return {
        "scale": (0.02 * jax.random.normal(ks[0], (1,))).astype(jnp.float32),
        "scale_shift": (0.02 * jax.random.normal(ks[1], (1,))).astype(jnp.float32),
        "g_scale": (0.02 * jax.random.normal(ks[2], (1,))).astype(jnp.float32),
        "g_shift": (0.02 * jax.random.normal(ks[3], (1,))).astype(jnp.float32),
    }


# ---------------------------------------------------------------------------
# Pure-JAX reference (mirrors the PyTorch forward) for a correctness check
# ---------------------------------------------------------------------------
def reference_forward(x, p, inplace=0):
    x = x.astype(jnp.float32)
    x1, x2 = x[:, 0:1], x[:, 1:2]
    if inplace == 0:
        log_scale = p["scale"] * jnp.tanh(p["g_scale"] * x1) + p["scale_shift"]
        z2 = jnp.exp(log_scale) * x2 + p["g_shift"]
        z = jnp.concatenate([x1, z2], axis=1)
    else:
        log_scale = p["scale"] * jnp.tanh(p["g_scale"] * x2) + p["scale_shift"]
        z1 = jnp.exp(log_scale) * x1 + p["g_shift"]
        z = jnp.concatenate([z1, x2], axis=1)
    return z, log_scale


# ---------------------------------------------------------------------------
if __name__ == "__main__":
    key = jax.random.PRNGKey(0)
    k_x, k_p = jax.random.split(key)
    params = init_params(k_p)

    # Small-but-tileable batch: 1024 points -> 2 parallel grid steps at tn=512.
    N = 1024
    x = jax.random.normal(k_x, (N, 2), dtype=jnp.float32)

    for inplace in (0, 1):
        z, log_scale = simple_coupling_layer_2d(x, params, inplace=inplace, tn=512)
        jax.block_until_ready((z, log_scale))
        z_ref, ls_ref = reference_forward(x, params, inplace=inplace)
        assert z.shape == (N, 2) and log_scale.shape == (N, 1)
        assert jnp.allclose(z, z_ref, atol=1e-5, rtol=1e-5)
        assert jnp.allclose(log_scale, ls_ref, atol=1e-5, rtol=1e-5)

    # Tiny, non-128-multiple batch exercises the padding path.
    x_small = jax.random.normal(k_x, (2, 2), dtype=jnp.float32)
    z_s, ls_s = simple_coupling_layer_2d(x_small, params, inplace=0)
    jax.block_until_ready((z_s, ls_s))
    z_sr, ls_sr = reference_forward(x_small, params, inplace=0)
    assert jnp.allclose(z_s, z_sr, atol=1e-5, rtol=1e-5)
    assert jnp.allclose(ls_s, ls_sr, atol=1e-5, rtol=1e-5)

    print("KERNEL_OK")
</pallas_src>

<mosaic_0001>
module attributes {stable_mosaic.version = 11 : i64} {
  func.func @_coupling_kernel(%arg0: i32, %arg1: memref<4xf32, #tpu.memory_space<smem>>, %arg2: memref<2x512xf32, #tpu.memory_space<vmem>>, %arg3: memref<2x512xf32, #tpu.memory_space<vmem>>, %arg4: memref<1x512xf32, #tpu.memory_space<vmem>>) attributes {dimension_semantics = [#tpu.dimension_semantics<parallel>], iteration_bounds = array<i64: 2>, scalar_prefetch = 0 : i64, scratch_operands = 0 : i64, tpu.core_type = #tpu.core_type<tc>, window_params = [{transform_indices = @transform_0, window_bounds = array<i64: 4>}, {transform_indices = @transform_1, window_bounds = array<i64: 2, 512>}, {transform_indices = @transform_2, window_bounds = array<i64: 2, 512>}, {transform_indices = @transform_3, window_bounds = array<i64: 1, 512>}]} {
    %c0 = arith.constant 0 : index
    %0 = memref.load %arg1[%c0] : memref<4xf32, #tpu.memory_space<smem>>
    %c1 = arith.constant 1 : index
    %1 = memref.load %arg1[%c1] : memref<4xf32, #tpu.memory_space<smem>>
    %c2 = arith.constant 2 : index
    %2 = memref.load %arg1[%c2] : memref<4xf32, #tpu.memory_space<smem>>
    %c3 = arith.constant 3 : index
    %3 = memref.load %arg1[%c3] : memref<4xf32, #tpu.memory_space<smem>>
    %c0_0 = arith.constant 0 : index
    %c0_1 = arith.constant 0 : index
    %4 = vector.load %arg2[%c0_0, %c0_1] : memref<2x512xf32, #tpu.memory_space<vmem>>, vector<2x512xf32>
    %5 = vector.extract_strided_slice %4 {offsets = [0, 0], sizes = [1, 512], strides = [1, 1]} : vector<2x512xf32> to vector<1x512xf32>
    %6 = vector.extract_strided_slice %4 {offsets = [1, 0], sizes = [1, 512], strides = [1, 1]} : vector<2x512xf32> to vector<1x512xf32>
    %7 = vector.broadcast %2 : f32 to vector<1x512xf32>
    %8 = arith.mulf %7, %5 : vector<1x512xf32>
    %9 = math.tanh %8 : vector<1x512xf32>
    %10 = vector.broadcast %0 : f32 to vector<1x512xf32>
    %11 = arith.mulf %10, %9 : vector<1x512xf32>
    %12 = vector.broadcast %1 : f32 to vector<1x512xf32>
    %13 = arith.addf %11, %12 : vector<1x512xf32>
    %14 = math.exp %13 : vector<1x512xf32>
    %15 = arith.mulf %14, %6 : vector<1x512xf32>
    %16 = vector.broadcast %3 : f32 to vector<1x512xf32>
    %17 = arith.addf %15, %16 : vector<1x512xf32>
    %18 = tpu.concatenate %5, %17 in 0 : vector<1x512xf32>, vector<1x512xf32> -> vector<2x512xf32>
    %c0_2 = arith.constant 0 : index
    %c0_3 = arith.constant 0 : index
    %19 = vector.load %arg3[%c0_2, %c0_3] : memref<2x512xf32, #tpu.memory_space<vmem>>, vector<2x512xf32>
    tpu.vector_store %arg3[%c0_2, %c0_3], %18 {strides = array<i32>} : memref<2x512xf32, #tpu.memory_space<vmem>>, vector<2x512xf32>,
    %c0_4 = arith.constant 0 : index
    %c0_5 = arith.constant 0 : index
    %20 = vector.load %arg4[%c0_4, %c0_5] : memref<1x512xf32, #tpu.memory_space<vmem>>, vector<1x512xf32>
    tpu.vector_store %arg4[%c0_4, %c0_5], %13 {strides = array<i32>} : memref<1x512xf32, #tpu.memory_space<vmem>>, vector<1x512xf32>,
    return
  }
  func.func @transform_0(%arg0: i32) -> i32 {
    %c0_i32 = arith.constant 0 : i32
    %c0_i32_0 = arith.constant 0 : i32
    return %c0_i32 : i32
  }
  func.func @transform_1(%arg0: i32) -> (i32, i32) {
    %c0_i32 = arith.constant 0 : i32
    %c0_i32_0 = arith.constant 0 : i32
    return %c0_i32, %arg0 : i32, i32
  }
  func.func @transform_2(%arg0: i32) -> (i32, i32) {
    %c0_i32 = arith.constant 0 : i32
    %c0_i32_0 = arith.constant 0 : i32
    return %c0_i32, %arg0 : i32, i32
  }
  func.func @transform_3(%arg0: i32) -> (i32, i32) {
    %c0_i32 = arith.constant 0 : i32
    %c0_i32_0 = arith.constant 0 : i32
    return %c0_i32, %arg0 : i32, i32
  }
}

</mosaic_0001>

<bundles_post_ra>
// kernel: tpu_custom_call.1
= control target key start
LH: loop header
LB: loop body
LE: loop exit
PB: predicated region body
PF: predicated region fallthrough
CT: control target
= control target key end

     0   :  { %9 = vsyncpa [#allocation5], 0  ;;  %s877_s0 = inlined_call_operand.hbm [shape: f32[4], index: 0, kind: input, shape index: {}]   ;;  %s878_s1 = inlined_call_operand.hbm [shape: f32[2,1024], index: 1, kind: input, shape index: {}]   ;;  %s879_s2 = inlined_call_operand.hbm [shape: f32[2,1024], index: 2, kind: output, shape index: {0}]   ;;  %s880_s3 = inlined_call_operand.hbm [shape: f32[1,1024], index: 3, kind: output, shape index: {1}]  }
   0x1   :  { %10 = vsyncpa [#allocation3], 0 }
   0x2   :  { %12 = vsyncpa [#allocation3 + $0x1], 0 }
   0x3   :  { %13 = vsyncpa [#allocation4], 0 }
   0x4   :  { %15 = vsyncpa [#allocation4 + $0x1], 0 }
   0x5   :  { %16 = vsyncpa [#allocation9], 0 }
   0x6   :  { %18 = vsyncpa [#allocation9 + $0x1], 0  ;;  %s701_s12 = smov 0   ;;  %s703_s13 = smov 0  }
   0x7   :  { %s705_s14 = smov 0   ;;  %s707_s15 = smov 0  }
   0x8 LB: > { %s722_s16 = sadd.s32 4294967295, %s678_s15   ;;  %s440_s17 = sadd.s32 4294967294, %s678_s15   ;;  %s678_s15 = sphi %s707_s15, %s890_s15   ;;  %s674_s14 = sphi %s705_s14, %s889_s14   ;;  %s670_s13 = sphi %s703_s13, %s888_s13   ;;  %s666_s12 = sphi %s701_s12, %s887_s12  }
   0x9   : > { %p65_p0 = scmp.ne.s32.totalorder %s670_s13, %s666_s12  ;;  %p66_p1 = scmp.eq.s32.totalorder %s722_s16, 0 }
   0xa   : > { %p89_p2 = scmp.eq.s32.totalorder %s722_s16, 1  ;;  %p95_p3 = scmp.eq.s32.totalorder %s440_s17, 1 }
   0xb   : > { %p731_p4 = por %p66_p1, %p65_p0  ;;  %p441_p5 = scmp.ge.s32.totalorder %s678_s15, 1 }
   0xc   : > { %p736_p6 = por %p95_p3, %p65_p0  ;;  %p128_p7 = scmp.lt.s32.totalorder %s678_s15, 3 }
   0xd   : > { %s140_s22 = sshll.u32 %s877_s0, 4  ;;  %s752_s24 = sadd.s32 1, %s678_s15   ;;  %s141_s22 = int_to_ptr.hbm [resolvable:$true] %s140_s22 }
   0xe   : > { %p744_p8 = pnand %p441_p5, %p128_p7  ;;  %s49_s25 = ssub.s32 %s678_s15, %s752_s24 }
   0xf   : > { %p50_p12 = scmp.eq.s32.totalorder %s49_s25, 0  ;;  %s52_s26 = sadd.s32 1, %s674_s14 }
  0x10   : > { %p475_p10 = pneg %p744_p8  ;;  %p59_p13 = scmp.ne.s32.totalorder %s674_s14, %s670_s13 }
  0x11   : > { %s680_s27 = smov [#allocation2]   ;;  %p60_p0 = scmp.eq.s32.totalorder %s678_s15, 0 }
  0x12   : > { %p476_p11 = pnand %p475_p10, %p66_p1  ;;  %p767_p3 = por %p89_p2, %p59_p13 }
  0x13   : > { %s762_s28 = scalar_select %p50_p12, %s674_s14, %s52_s26  }
  0x14   : > { %478 = dma.hbm_to_smem (!%p476_p11), %s141_s22, 16, %s680_s27, [#allocation5]  }
  0x15   : > { %s151_s30 = sand.u32 1, %s674_s14   ;;  %p61_p5 = por %p60_p0, %p59_p13 }
  0x16   : > { %p491_p7 = scmp.lt.s32.totalorder %s678_s15, 2  ;;  %s444_s4 = sshll.u32 %s151_s30, 3 }
  0x17   : > { %s463_s5 = sshll.u32 %s678_s15, 3  ;;  %s155_s10 = scalar_lea.vmem [#allocation6], %s444_s4 }
  0x18   : > { %s160_s8 = scalar_lea.hbm %s878_s1, %s463_s5  ;;  %s164_s11 = sshll.u32 %s155_s10, 4  ;;  %s165_s11 = int_to_ptr.vmem [resolvable:$true] %s164_s11 }
  0x19   : > { %s162_s9 = sshll.u32 %s160_s8, 4  ;;  %p777_p10 = pnand %p491_p7, %p61_p5  ;;  %s163_s9 = int_to_ptr.hbm [resolvable:$true] %s162_s9 }
  0x1a   : > { %s152_s20 = scalar_lea.sflag [#allocation3], %s151_s30  ;;  %s546_s21 = sshra.s32 %s163_s9, 4  ;;  %s547_s21 = int_to_ptr.hbm [resolvable:$true] %s546_s21 }
  0x1b   : > { %s548_s22 = scalar_lea.hbm %s547_s21, 8  ;;  %p550_p11 = pneg %p777_p10 }
  0x1c   : > { %p549_p2 = scmp.ne.s32.totalorder %s547_s21, %s548_s22  ;;  %s553_s27 = scalar_lea.hbm %s878_s1, 16 }
  0x1d   : > { %p554_p0 = scmp.lt.s32.totalorder %s547_s21, %s878_s1  ;;  %p555_p5 = scmp.lt.s32.totalorder %s553_s27, %s548_s22 }
  0x1e   : > { %p551_p12 = pnand %p550_p11, %p549_p2 }
  0x1f   : > { %p556_p7 = por %p555_p5, %p554_p0 }
  0x20   : > { %p552_p13 = pneg %p551_p12 }
  0x22   : > { %p557_p9 = pnand %p556_p7, %p552_p13 }
  0x24   : > { %560 = shalt.err (!%p557_p9)
}
  0x25   : > { %482 = dma.hbm_to_vmem [thread:$0]  (!%p777_p10), %s163_s9, 128, %s165_s11, %s152_s20  }
  0x26   : > { %173 = sbr.rel (%p744_p8) target bundleno = 93 (0x5d), region = 28 }
  0x2b   : > { %649 = dma.done.wait (%p66_p1), [#allocation5], 16  }
  0x2c   : > { %651 = vsyncadd (%p66_p1), [#allocation5], 4294967280  ;;  %s798_s30 = sand.u32 1, %s670_s13  }
  0x2d   : > { %s449_s6 = sshll.u32 %s798_s30, 3  ;;  %s181_s7 = scalar_lea.sflag [#allocation3], %s798_s30 }
  0x2e   : > { %s184_s8 = scalar_lea.vmem [#allocation6], %s449_s6 }
  0x2f   : > { %653 = dma.done.wait (%p731_p4), %s181_s7, 128  }
  0x30   : > { %655 = vsyncadd (%p731_p4), %s181_s7, 4294967168 }
  0x31   : > { %190 = sfence }
  0x32   : > { %s453_s23 = sld [smem:[#allocation2 + $0x2]]  ;;  %v808_v0 = vld [vmem:[%s184_s8] sm:$0xff]  ;;  %s451_s11 = sshll.u32 %s798_s30, 2  ;;  %v284_v7 = vlaneseq  ;;  %vm267_vm0 = vcmask 1041408   ;;  %vm280_vm1 = vcmask 1042434   ;;  %vm255_vm2 = vcmask 1040384  }
  0x33   : > { %s217_s9 = sld [smem:[#allocation2]]  ;;  %s460_s17 = sshll.u32 %s722_s16, 2  ;;  %v455_v16 = vrot.slane %v808_v0, 9 }
  0x34   : > { %s452_s10 = sld [smem:[#allocation2 + $0x1]]  ;;  %s320_s21 = scalar_lea.hbm %s880_s3, %s460_s17  ;;  %vm286_vm3 = vcmp.lt.s32.totalorder %v284_v7, 512 }
  0x35   : > { %s213_s22 = scalar_lea.vmem [#allocation8], %s451_s11  ;;  %s816_s26 = sld [smem:[#allocation2 + $0x3]] }
  0x36   : > { %s322_s25 = sshll.u32 %s213_s22, 4  ;;  %s324_s27 = sshll.u32 %s320_s21, 4  ;;  %s323_s25 = int_to_ptr.vmem [resolvable:$true] %s322_s25  ;;  %s325_s27 = int_to_ptr.hbm [resolvable:$true] %s324_s27 }
  0x37   : > { %s295_s4 = scalar_lea.sflag [#allocation9], %s798_s30  ;;  %s590_s5 = sshra.s32 %s325_s27, 4  ;;  %s591_s5 = int_to_ptr.hbm [resolvable:$true] %s590_s5 }
  0x38   : > { %v222_v1 = vstv %s453_s23  ;;  %s592_s7 = scalar_lea.hbm %s591_s5, 4  ;;  %p597_p9 = scmp.lt.s32.totalorder %s591_s5, %s880_s3 }
  0x39   : > { %v223_v2 = vmul.f32 %v222_v1, %v808_v0  ;;  %v225_v3 = vstv %s217_s9  ;;  %p593_p1 = scmp.ne.s32.totalorder %s591_s5, %s592_s7  ;;  %s596_s9 = scalar_lea.hbm %s880_s3, 8 }
  0x3a   : > { %v227_v5 = vstv %s452_s10  ;;  %p598_p10 = scmp.lt.s32.totalorder %s596_s9, %s592_s7 }
  0x3b   : > { %527 = vtanh.f32 %v223_v2  ;;  %p594_p4 = pnand %p593_p1, %p767_p3 }
  0x3c   : > { %p599_p2 = por %p598_p10, %p597_p9 }
  0x3d   : > { %p595_p8 = pneg %p594_p4 }
  0x3f   : > { %p600_p11 = pnand %p599_p2, %p595_p8 }
  0x41   : > { %v528_v4 = vpop.eup %527 }
  0x42   : > { %v226_v6 = vmul.f32 %v528_v4, %v225_v3 }
  0x44   : > { %v228_v8 = vadd.f32 %v227_v5, %v226_v6 }
  0x46   : > { %v229_v9 = vmul.f32 1.442695, %v228_v8  ;;  %v276_v10 = vrot.slane %v228_v8, 1  ;;  %v277_v11 = vrot.slane %v228_v8, 2  ;;  %v278_v12 = vrot.slane %v228_v8, 3 }
  0x48   : > { %529 = vpow2.f32 %v229_v9  ;;  %v279_v13 = vsel %vm255_vm2, %v228_v8, %v276_v10  ;;  %v281_v14 = vsel %vm280_vm1, %v277_v11, %v278_v12 }
  0x49   : > { %v282_v15 = vsel %vm267_vm0, %v279_v13, %v281_v14 }
  0x4a   : > { %288 = vst.msk [vmem:[%s213_s22] sm:$0xf] %vm286_vm3, %v282_v15 }
  0x4b   : > { %603 = shalt.err (!%p600_p11)
}
  0x4c   : > { %472 = dma.vmem_to_hbm [thread:$0]  (%p767_p3), %s323_s25, 64, %s325_s27, %s295_s4   ;;  %v236_v18 = vstv %s816_s26  ;;  %v238_v20 = vperm.slane %v808_v0, 0  ;;  %v239_v22 = vperm.slane %v808_v0, 2  ;;  %v240_v23 = vperm.slane %v808_v0, 4 }
  0x4d   : > { %s464_s17 = sshll.u32 %s722_s16, 3  ;;  %v241_v24 = vperm.slane %v808_v0, 6  ;;  %vm269_vm4 = vcmask 1045508   ;;  %s206_s16 = scalar_lea.vmem [#allocation7], %s449_s6  ;;  %vm271_vm5 = vcmask 1043456  }
  0x4e   : > { %v530_v17 = vpop.eup %529  ;;  %s306_s21 = scalar_lea.hbm %s879_s2, %s464_s17  ;;  %s308_s22 = sshll.u32 %s206_s16, 4  ;;  %s309_s22 = int_to_ptr.vmem [resolvable:$true] %s308_s22 }
  0x4f   : > { %v235_v19 = vmul.f32 %v530_v17, %v455_v16  ;;  %s310_s25 = sshll.u32 %s306_s21, 4  ;;  %s290_s6 = scalar_lea.sflag [#allocation4], %s798_s30  ;;  %s311_s25 = int_to_ptr.hbm [resolvable:$true] %s310_s25 }
  0x50   : > { %s618_s26 = sshra.s32 %s311_s25, 4  ;;  %s624_s7 = scalar_lea.hbm %s879_s2, 16  ;;  %s619_s26 = int_to_ptr.hbm [resolvable:$true] %s618_s26 }
  0x51   : > { %v237_v21 = vadd.f32 %v236_v18, %v235_v19  ;;  %s620_s27 = scalar_lea.hbm %s619_s26, 8  ;;  %p625_p5 = scmp.lt.s32.totalorder %s619_s26, %s879_s2 }
  0x52   : > { %p621_p12 = scmp.ne.s32.totalorder %s619_s26, %s620_s27  ;;  %p626_p7 = scmp.lt.s32.totalorder %s624_s7, %s620_s27 }
  0x53   : > { %v247_v25 = vperm.slane %v237_v21, 0  ;;  %v248_v26 = vperm.slane %v237_v21, 2  ;;  %v249_v27 = vperm.slane %v237_v21, 4  ;;  %v250_v28 = vperm.slane %v237_v21, 6 }
  0x54   : > { %p622_p13 = pnand %p621_p12, %p767_p3  ;;  %p627_p1 = por %p626_p7, %p625_p5 }
  0x55   : > { %v256_v29 = vsel %vm255_vm2, %v238_v20, %v247_v25  ;;  %v257_v30 = vsel %vm255_vm2, %v239_v22, %v248_v26  ;;  %v258_v31 = vsel %vm255_vm2, %v240_v23, %v249_v27  ;;  %v259_v32 = vsel %vm255_vm2, %v241_v24, %v250_v28 }
  0x56   : > { %v264_v33 = vrot.slane %v257_v30, 6  ;;  %v265_v34 = vrot.slane %v258_v31, 4  ;;  %v266_v35 = vrot.slane %v259_v32, 2  ;;  %p623_p0 = pneg %p622_p13 }
  0x58   : > { %v268_v36 = vsel %vm267_vm0, %v256_v29, %v264_v33  ;;  %v270_v37 = vsel %vm269_vm4, %v265_v34, %v266_v35  ;;  %p628_p4 = pnand %p627_p1, %p623_p0 }
  0x59   : > { %v272_v38 = vsel %vm271_vm5, %v268_v36, %v270_v37 }
  0x5a   : > { %274 = vst [vmem:[%s206_s16] sm:$0xff] %v272_v38 }
  0x5b   : > { %631 = shalt.err (!%p628_p4)
}
  0x5c   : > { %471 = dma.vmem_to_hbm [thread:$0]  (%p767_p3), %s309_s22, 128, %s311_s25, %s290_s6  }
  0x5d PF: > { %s336_s30 = sand.u32 1, %s666_s12   ;;  %p886_p8 = scmp.ge.s32.totalorder %s678_s15, 2 }
  0x5e   : > { %s337_s9 = scalar_lea.sflag [#allocation4], %s336_s30 }
  0x5f   : > { %p484_p9 = pnand %p886_p8, %p736_p6 }
  0x61   : > { %p485_p10 = pneg %p484_p9 }
  0x63   : > { %657 = dma.done.wait (%p485_p10), %s337_s9, 128  }
  0x64   : > { %659 = vsyncadd (%p485_p10), %s337_s9, 4294967168  ;;  %s347_s10 = scalar_lea.sflag [#allocation9], %s336_s30 }
  0x65   : > { %661 = dma.done.wait (%p485_p10), %s347_s10, 64  }
  0x66   : > { %663 = vsyncadd (%p485_p10), %s347_s10, 4294967232  ;;  %p21_p3 = scmp.ge.s32.totalorder %s752_s24, 4   ;;  %s887_s12 = smov %s670_s13 }
  0x67   : > { %s888_s13 = smov %s674_s14  ;;  %s889_s14 = smov %s762_s28 }
  0x68   : > { %s890_s15 = smov %s752_s24  ;;  %23 = sbr.rel (!%p21_p3) target bundleno = 8 (0x8), region = 95 }
  0x6d   :  { %353 = vsyncpa [#allocation3], 1 }
  0x6e   :  { %355 = vsyncpa [#allocation3 + $0x1], 1 }
  0x6f   :  { %356 = vsyncpa [#allocation4], 1 }
  0x70   :  { %358 = vsyncpa [#allocation4 + $0x1], 1 }
  0x71   :  { %359 = vsyncpa [#allocation9], 1 }
  0x72   :  { %361 = vsyncpa [#allocation9 + $0x1], 1 }
  0x73   :  { %362 = vsyncpa [#allocation5], 1 }
  0x74   :  { %364 = vsyncpa [#allocation5 + $0x1], 1 }

</bundles_post_ra>
